<compile_context>
chip_gen: v7x
topology: tpu7x:2x2x1
jax: 0.10.0
libtpu: 0.0.40
codegen_flags: <defaults>
</compile_context>

<pallas_src>
import functools

import jax
import jax.numpy as jnp
from jax import lax
from jax.experimental import pallas as pl
from jax.experimental.pallas import tpu as pltpu


def _round8(v):
    return -(-v // 8) * 8


def _param_layout(C0, C1, C2, CF):
    """Row offsets of each weight block inside the packed (rows, lanes) param slab."""
    w1_off = 8                            # rows 0..1 hold the biases
    w2_off = w1_off + _round8(9 * C0)
    wt_off = w2_off + _round8(9 * C1)
    p_rows = wt_off + _round8(C2)
    p_cols = max(C1 + C2, 4 * CF)
    return w1_off, w2_off, wt_off, p_rows, p_cols


def _pack_params(params, layout):
    """Pack all weights/biases into one 2-D f32 slab (single DMA into the kernel)."""
    w1, b1, w2, b2, wt, bt = params
    C0, C1 = w1.shape[2], w1.shape[3]
    C2, CF = w2.shape[3], wt.shape[1]
    w1_off, w2_off, wt_off, p_rows, p_cols = layout
    P = jnp.zeros((p_rows, p_cols), jnp.float32)
    P = P.at[0, 0:C1].set(b1)
    P = P.at[0, C1:C1 + C2].set(b2)
    P = P.at[1, 0:4 * CF].set(jnp.tile(bt, 4))                       # bias per (di,dj,c) column
    P = P.at[w1_off:w1_off + 9 * C0, 0:C1].set(w1.reshape(9 * C0, C1))   # HWIO -> (9*C0, C1)
    P = P.at[w2_off:w2_off + 9 * C1, 0:C2].set(w2.reshape(9 * C1, C2))
    P = P.at[wt_off:wt_off + C2, 0:4 * CF].set(
        jnp.transpose(wt, (0, 2, 3, 1)).reshape(C2, 4 * CF))         # (C2,CF,2,2) -> (C2,(di,dj,CF))
    return P


def unet_block_kernel(x_ref, p_ref, o_ref, *, B, Hp, Wp, C0, C1, C2, CF,
                      w1_off, w2_off, wt_off):
    G = Hp * Wp
    rows = B * G                        # pooled-grid rows (M of the conv1 matmul)
    h1o, w1o = Hp - 2, Wp - 2           # conv1 valid output extent
    h2o, w2o = h1o - 2, w1o - 2         # conv2 valid output extent

    # Rows actually consumed downstream (garbage-border scheme: rows whose (i,j)
    # exceed the valid conv extent hold garbage and are never consumed).
    n1 = (B - 1) * G + (h1o - 1) * Wp + w1o
    n2 = (B - 1) * G + (h2o - 1) * Wp + w2o
    n1r = _round8(n1)                   # round up to a sublane multiple
    n2r = _round8(n2)
    # Aligned-offset tap windows must stay inside their source slabs, and
    # ki*Wp offsets must be sublane-aligned (the whole shift/slice scheme).
    assert Wp % 8 == 0
    assert 2 * Wp + n1r <= rows and 2 * Wp + n2r <= n1r

    # ---- packed parameters: one DMA, static slices ----
    w1 = p_ref[w1_off:w1_off + 9 * C0, 0:C1]
    w2 = p_ref[w2_off:w2_off + 9 * C1, 0:C2]
    wt = p_ref[wt_off:wt_off + C2, 0:4 * CF]
    b1 = p_ref[0:1, 0:C1]
    b2 = p_ref[0:1, C1:C1 + C2]
    bt = p_ref[1:2, 0:4 * CF]

    # ---- MaxPool2d(2, stride=2): max over the 4 window elements packed in lanes ----
    xw = x_ref[...]                                                    # (rows, 4*C0)
    xp = jnp.maximum(jnp.maximum(xw[:, 0 * C0:1 * C0], xw[:, 1 * C0:2 * C0]),
                     jnp.maximum(xw[:, 2 * C0:3 * C0], xw[:, 3 * C0:4 * C0]))  # (rows, C0)

    # ---- Conv1 3x3 valid + ReLU ----
    # kj shifts (+1, +2 rows) as two sublane rolls (wrapped rows land only in
    # never-consumed garbage border rows); ki shifts as Wp-aligned row slices.
    xp1 = pltpu.roll(xp, rows - 1, axis=0)          # xp1[r] = xp[r + 1]
    xp2 = pltpu.roll(xp, rows - 2, axis=0)          # xp2[r] = xp[r + 2]
    q1 = jnp.concatenate([xp, xp1, xp2], axis=1)                       # (rows, 3*C0), lanes (kj,c)
    p1 = jnp.concatenate([q1[0:n1r], q1[Wp:Wp + n1r], q1[2 * Wp:2 * Wp + n1r]],
                         axis=1)                                       # (n1r, 9*C0), lanes (ki,kj,c)
    h1 = jnp.maximum(jnp.dot(p1, w1, preferred_element_type=jnp.float32) + b1, 0.0)

    # ---- Conv2 3x3 valid + ReLU ----
    h1s1 = pltpu.roll(h1, n1r - 1, axis=0)
    h1s2 = pltpu.roll(h1, n1r - 2, axis=0)
    q2 = jnp.concatenate([h1, h1s1, h1s2], axis=1)                     # (n1r, 3*C1)
    p2 = jnp.concatenate([q2[0:n2r], q2[Wp:Wp + n2r], q2[2 * Wp:2 * Wp + n2r]],
                         axis=1)                                       # (n2r, 9*C1)
    h2 = jnp.maximum(jnp.dot(p2, w2, preferred_element_type=jnp.float32) + b2, 0.0)

    # ---- ConvTranspose2d(k=2, s=2): one matmul, lanes = (di, dj, Cout) ----
    y = jnp.dot(h2, wt, preferred_element_type=jnp.float32) + bt       # (n2r, 4*CF)

    # ---- Gather valid rows into the lane-dense output slab ----
    # rows = j2, lanes = (b, i2, di, dj, c); all source row offsets are multiples of 8.
    o_ref[...] = jnp.concatenate(
        [y[b * G + i2 * Wp: b * G + i2 * Wp + w2o, :]
         for b in range(B) for i2 in range(h2o)],
        axis=1)


@jax.jit
def unet_block_forward(x_nchw, params):
    w1, b1, w2, b2, wt, bt = params
    B, C0, H, W = x_nchw.shape
    # TODO(synk): MaxPool2d ceil_mode=True partial windows (odd H/W) not handled here.
    assert H % 2 == 0 and W % 2 == 0
    Hp, Wp = H // 2, W // 2
    assert Wp % 8 == 0, "aligned-offset im2col scheme assumes Wp is a multiple of 8"
    G = Hp * Wp
    C1, C2, CF = w1.shape[-1], w2.shape[-1], wt.shape[1]
    h2o, w2o = Hp - 4, Wp - 4

    layout = _param_layout(C0, C1, C2, CF)
    w1_off, w2_off, wt_off, _, _ = layout

    # Layout glue (fuses to a single transpose under jit):
    # NCHW -> rows=(b,i,j) pooled grid, lanes=(di,dj,c) pool-window elements.
    x = jnp.transpose(x_nchw, (0, 2, 3, 1))                            # NHWC
    xk = (x.reshape(B, Hp, 2, Wp, 2, C0)
           .transpose(0, 1, 3, 2, 4, 5)
           .reshape(B * G, 4 * C0))

    pk = _pack_params(params, layout)

    kernel = functools.partial(
        unet_block_kernel, B=B, Hp=Hp, Wp=Wp, C0=C0, C1=C1, C2=C2, CF=CF,
        w1_off=w1_off, w2_off=w2_off, wt_off=wt_off)

    out = pl.pallas_call(
        kernel,
        out_shape=jax.ShapeDtypeStruct((w2o, B * h2o * 4 * CF), jnp.float32),
    )(xk, pk)

    # Layout glue: (j2, (b, i2, di, dj, c)) -> NCHW (B, CF, 2*h2o, 2*w2o).
    y = out.reshape(w2o, B, h2o, 2, 2, CF)
    y = jnp.transpose(y, (1, 5, 2, 3, 0, 4)).reshape(B, CF, 2 * h2o, 2 * w2o)
    return y


def reference_forward(x_nchw, params):
    """Pure-JAX (XLA) reference with PyTorch semantics, for verification."""
    w1, b1, w2, b2, wt, bt = params
    x = jnp.transpose(x_nchw, (0, 2, 3, 1))
    x = lax.reduce_window(x, -jnp.inf, lax.max, (1, 2, 2, 1), (1, 2, 2, 1), "VALID")
    dn = ("NHWC", "HWIO", "NHWC")
    h = lax.conv_general_dilated(x, w1, (1, 1), "VALID", dimension_numbers=dn) + b1
    h = jax.nn.relu(h)
    h = lax.conv_general_dilated(h, w2, (1, 1), "VALID", dimension_numbers=dn) + b2
    h = jax.nn.relu(h)
    # ConvTranspose2d(k=2, s=2): out[n, 2i+k, 2j+l, o] = sum_c h[n,i,j,c] * wt[c,o,k,l]
    t = jnp.einsum("nhwc,cokl->nhkwlo", h, wt)
    B, H2, _, W2, _, cf = t.shape
    y = t.reshape(B, 2 * H2, 2 * W2, cf) + bt
    return jnp.transpose(y, (0, 3, 1, 2))


if __name__ == "__main__":
    key = jax.random.PRNGKey(0)
    ks = jax.random.split(key, 7)
    B, C0, H, W = 2, 4, 16, 16
    C1, C2, CF = 8, 8, 4          # features = (4, 8, 8); upsample -> 8 // 2 = 4

    x = jax.random.normal(ks[0], (B, C0, H, W), jnp.float32)
    w1 = jax.random.normal(ks[1], (3, 3, C0, C1), jnp.float32) * 0.2   # HWIO
    b1 = jax.random.normal(ks[2], (C1,), jnp.float32) * 0.1
    w2 = jax.random.normal(ks[3], (3, 3, C1, C2), jnp.float32) * 0.2   # HWIO
    b2 = jax.random.normal(ks[4], (C2,), jnp.float32) * 0.1
    wt = jax.random.normal(ks[5], (C2, CF, 2, 2), jnp.float32) * 0.2   # PyTorch (Cin,Cout,kH,kW)
    bt = jax.random.normal(ks[6], (CF,), jnp.float32) * 0.1
    params = (w1, b1, w2, b2, wt, bt)

    out = jax.block_until_ready(unet_block_forward(x, params))
    ref = jax.block_until_ready(reference_forward(x, params))

    assert out.shape == (B, CF, H // 2, W // 2), out.shape
    if not jnp.allclose(out, ref, atol=1e-4, rtol=1e-4):
        raise AssertionError("Pallas kernel output does not match reference")
    print("KERNEL_OK")
</pallas_src>

<mosaic_0001>
module attributes {stable_mosaic.version = 11 : i64} {
  func.func @unet_block_kernel(%arg0: memref<128x16xf32, #tpu.memory_space<vmem>>, %arg1: memref<128x16xf32, #tpu.memory_space<vmem>>, %arg2: memref<4x128xf32, #tpu.memory_space<vmem>>) attributes {dimension_semantics = [], scalar_prefetch = 0 : i64, scratch_operands = 0 : i64, tpu.core_type = #tpu.core_type<tc>} {
    %c8 = arith.constant 8 : index
    %c0 = arith.constant 0 : index
    %0 = vector.load %arg1[%c8, %c0] : memref<128x16xf32, #tpu.memory_space<vmem>>, vector<36x8xf32>
    %c48 = arith.constant 48 : index
    %c0_0 = arith.constant 0 : index
    %1 = vector.load %arg1[%c48, %c0_0] : memref<128x16xf32, #tpu.memory_space<vmem>>, vector<72x8xf32>
    %c120 = arith.constant 120 : index
    %c0_1 = arith.constant 0 : index
    %2 = vector.load %arg1[%c120, %c0_1] : memref<128x16xf32, #tpu.memory_space<vmem>>, vector<8x16xf32>
    %c0_2 = arith.constant 0 : index
    %c0_3 = arith.constant 0 : index
    %3 = vector.load %arg1[%c0_2, %c0_3] : memref<128x16xf32, #tpu.memory_space<vmem>>, vector<1x8xf32>
    %c0_4 = arith.constant 0 : index
    %c8_5 = arith.constant 8 : index
    %4 = vector.load %arg1[%c0_4, %c8_5] : memref<128x16xf32, #tpu.memory_space<vmem>>, vector<1x8xf32>
    %c1 = arith.constant 1 : index
    %c0_6 = arith.constant 0 : index
    %5 = vector.load %arg1[%c1, %c0_6] : memref<128x16xf32, #tpu.memory_space<vmem>>, vector<1x16xf32>
    %c0_7 = arith.constant 0 : index
    %c0_8 = arith.constant 0 : index
    %6 = vector.load %arg0[%c0_7, %c0_8] : memref<128x16xf32, #tpu.memory_space<vmem>>, vector<128x16xf32>
    %7 = vector.extract_strided_slice %6 {offsets = [0, 0], sizes = [128, 4], strides = [1, 1]} : vector<128x16xf32> to vector<128x4xf32>
    %8 = vector.extract_strided_slice %6 {offsets = [0, 4], sizes = [128, 4], strides = [1, 1]} : vector<128x16xf32> to vector<128x4xf32>
    %9 = arith.maximumf %7, %8 : vector<128x4xf32>
    %10 = vector.extract_strided_slice %6 {offsets = [0, 8], sizes = [128, 4], strides = [1, 1]} : vector<128x16xf32> to vector<128x4xf32>
    %11 = vector.extract_strided_slice %6 {offsets = [0, 12], sizes = [128, 4], strides = [1, 1]} : vector<128x16xf32> to vector<128x4xf32>
    %12 = arith.maximumf %10, %11 : vector<128x4xf32>
    %13 = arith.maximumf %9, %12 : vector<128x4xf32>
    %c127_i32 = arith.constant 127 : i32
    %14 = tpu.dynamic_rotate %13 by %c127_i32 dim 0 : vector<128x4xf32>, i32 -> vector<128x4xf32>
    %c126_i32 = arith.constant 126 : i32
    %15 = tpu.dynamic_rotate %13 by %c126_i32 dim 0 : vector<128x4xf32>, i32 -> vector<128x4xf32>
    %16 = tpu.concatenate %13, %14, %15 in 1 : vector<128x4xf32>, vector<128x4xf32>, vector<128x4xf32> -> vector<128x12xf32>
    %17 = vector.extract_strided_slice %16 {offsets = [0, 0], sizes = [112, 12], strides = [1, 1]} : vector<128x12xf32> to vector<112x12xf32>
    %18 = vector.extract_strided_slice %16 {offsets = [8, 0], sizes = [112, 12], strides = [1, 1]} : vector<128x12xf32> to vector<112x12xf32>
    %19 = vector.extract_strided_slice %16 {offsets = [16, 0], sizes = [112, 12], strides = [1, 1]} : vector<128x12xf32> to vector<112x12xf32>
    %20 = tpu.concatenate %17, %18, %19 in 1 : vector<112x12xf32>, vector<112x12xf32>, vector<112x12xf32> -> vector<112x36xf32>
    %cst = arith.constant dense<0.000000e+00> : vector<112x8xf32>
    %21 = tpu.matmul %20, %0, %cst {dimension_numbers = #tpu.dot_dimension_numbers<[1], [0], [0], [1], [0, 0, 1, 1], [], []>} : vector<112x36xf32>, vector<36x8xf32>, vector<112x8xf32> -> vector<112x8xf32>
    %22 = vector.broadcast %3 : vector<1x8xf32> to vector<112x8xf32>
    %23 = arith.addf %21, %22 : vector<112x8xf32>
    %cst_9 = arith.constant 0.000000e+00 : f32
    %24 = vector.broadcast %cst_9 : f32 to vector<112x8xf32>
    %25 = arith.maximumf %23, %24 : vector<112x8xf32>
    %c111_i32 = arith.constant 111 : i32
    %26 = tpu.dynamic_rotate %25 by %c111_i32 dim 0 : vector<112x8xf32>, i32 -> vector<112x8xf32>
    %c110_i32 = arith.constant 110 : i32
    %27 = tpu.dynamic_rotate %25 by %c110_i32 dim 0 : vector<112x8xf32>, i32 -> vector<112x8xf32>
    %28 = tpu.concatenate %25, %26, %27 in 1 : vector<112x8xf32>, vector<112x8xf32>, vector<112x8xf32> -> vector<112x24xf32>
    %29 = vector.extract_strided_slice %28 {offsets = [0, 0], sizes = [96, 24], strides = [1, 1]} : vector<112x24xf32> to vector<96x24xf32>
    %30 = vector.extract_strided_slice %28 {offsets = [8, 0], sizes = [96, 24], strides = [1, 1]} : vector<112x24xf32> to vector<96x24xf32>
    %31 = vector.extract_strided_slice %28 {offsets = [16, 0], sizes = [96, 24], strides = [1, 1]} : vector<112x24xf32> to vector<96x24xf32>
    %32 = tpu.concatenate %29, %30, %31 in 1 : vector<96x24xf32>, vector<96x24xf32>, vector<96x24xf32> -> vector<96x72xf32>
    %cst_10 = arith.constant dense<0.000000e+00> : vector<96x8xf32>
    %33 = tpu.matmul %32, %1, %cst_10 {dimension_numbers = #tpu.dot_dimension_numbers<[1], [0], [0], [1], [0, 0, 1, 1], [], []>} : vector<96x72xf32>, vector<72x8xf32>, vector<96x8xf32> -> vector<96x8xf32>
    %34 = vector.broadcast %4 : vector<1x8xf32> to vector<96x8xf32>
    %35 = arith.addf %33, %34 : vector<96x8xf32>
    %cst_11 = arith.constant 0.000000e+00 : f32
    %36 = vector.broadcast %cst_11 : f32 to vector<96x8xf32>
    %37 = arith.maximumf %35, %36 : vector<96x8xf32>
    %cst_12 = arith.constant dense<0.000000e+00> : vector<96x16xf32>
    %38 = tpu.matmul %37, %2, %cst_12 {dimension_numbers = #tpu.dot_dimension_numbers<[1], [0], [0], [1], [0, 0, 1, 1], [], []>} : vector<96x8xf32>, vector<8x16xf32>, vector<96x16xf32> -> vector<96x16xf32>
    %39 = vector.broadcast %5 : vector<1x16xf32> to vector<96x16xf32>
    %40 = arith.addf %38, %39 : vector<96x16xf32>
    %41 = vector.extract_strided_slice %40 {offsets = [0, 0], sizes = [4, 16], strides = [1, 1]} : vector<96x16xf32> to vector<4x16xf32>
    %42 = vector.extract_strided_slice %40 {offsets = [8, 0], sizes = [4, 16], strides = [1, 1]} : vector<96x16xf32> to vector<4x16xf32>
    %43 = vector.extract_strided_slice %40 {offsets = [16, 0], sizes = [4, 16], strides = [1, 1]} : vector<96x16xf32> to vector<4x16xf32>
    %44 = vector.extract_strided_slice %40 {offsets = [24, 0], sizes = [4, 16], strides = [1, 1]} : vector<96x16xf32> to vector<4x16xf32>
    %45 = vector.extract_strided_slice %40 {offsets = [64, 0], sizes = [4, 16], strides = [1, 1]} : vector<96x16xf32> to vector<4x16xf32>
    %46 = vector.extract_strided_slice %40 {offsets = [72, 0], sizes = [4, 16], strides = [1, 1]} : vector<96x16xf32> to vector<4x16xf32>
    %47 = vector.extract_strided_slice %40 {offsets = [80, 0], sizes = [4, 16], strides = [1, 1]} : vector<96x16xf32> to vector<4x16xf32>
    %48 = vector.extract_strided_slice %40 {offsets = [88, 0], sizes = [4, 16], strides = [1, 1]} : vector<96x16xf32> to vector<4x16xf32>
    %49 = tpu.concatenate %41, %42, %43, %44, %45, %46, %47, %48 in 1 : vector<4x16xf32>, vector<4x16xf32>, vector<4x16xf32>, vector<4x16xf32>, vector<4x16xf32>, vector<4x16xf32>, vector<4x16xf32>, vector<4x16xf32> -> vector<4x128xf32>
    %c0_13 = arith.constant 0 : index
    %c0_14 = arith.constant 0 : index
    %50 = vector.load %arg2[%c0_13, %c0_14] : memref<4x128xf32, #tpu.memory_space<vmem>>, vector<4x128xf32>
    tpu.vector_store %arg2[%c0_13, %c0_14], %49 {strides = array<i32>} : memref<4x128xf32, #tpu.memory_space<vmem>>, vector<4x128xf32>,
    return
  }
}

</mosaic_0001>

<bundles_post_ra>
// kernel: tile.8
= control target key start
LH: loop header
LB: loop body
LE: loop exit
PB: predicated region body
PF: predicated region fallthrough
CT: control target
= control target key end

     0   :  { %s22_s0 = inlined_call_operand.vmem [shape: f32[4], index: 0, kind: input, shape index: {}]   ;;  %s23_s1 = inlined_call_operand.vmem [shape: f32[4,4], index: 1, kind: output, shape index: {}]  }
   0x1   :  { %v4_v0 = vld [vmem:[%s22_s0] ss:$0 sm:$0xff] }
   0x2   :  { %5 = vst [vmem:[%s23_s1] sm:$0xf] %v4_v0 }

// kernel: unet_block_forward.1
= control target key start
LH: loop header
LB: loop body
LE: loop exit
PB: predicated region body
PF: predicated region fallthrough
CT: control target
= control target key end

     0   :  { %s1674_s13 = smov 124   ;;  %s1675_s15 = smov 120   ;;  %v220_v48 = vlaneseq  ;;  %vm610_vm2 = vcmask 1043456   ;;  %vm400_vm3 = vcmask 31744   ;;  %vm417_vm4 = vcmask 64512   ;;  %s2555_s0 = inlined_call_operand.vmem [shape: f32[128,16], index: 0, kind: input, shape index: {}]   ;;  %s2556_s1 = inlined_call_operand.vmem [shape: f32[128,16], index: 1, kind: input, shape index: {}]   ;;  %s2557_s2 = inlined_call_operand.vmem [shape: f32[4,128], index: 2, kind: output, shape index: {}]  }
   0x1   :  { %v29_v0 = vld [vmem:[%s2555_s0 + $0x8] sm:$0xff]  ;;  %v31_v1 = vld [vmem:[%s2555_s0 + $0x18] sm:$0xff]  ;;  %v30_v2 = vld [vmem:[%s2555_s0 + $0x10] sm:$0xff]  ;;  %s1678_s26 = smov 12   ;;  %s1679_s27 = smov 24   ;;  %vm533_vm5 = vcmask 97280  }
   0x2   :  { %62 = vrot.lane.b32.xlu0 %v29_v0, %s1674_s13  ;;  %66 = vrot.lane.b32.xlu1 %v31_v1, %s1674_s13  ;;  %v32_v3 = vld [vmem:[%s2555_s0 + $0x20] sm:$0xff]  ;;  %v33_v4 = vld [vmem:[%s2555_s0 + $0x28] sm:$0xff]  ;;  %v1796_v50 = vshrl.u32 %v220_v48, 7  ;;  %vm548_vm6 = vcmask 195584   ;;  %vm567_vm7 = vcmask 293888   ;;  %s1680_s30 = smov 16  }
   0x3   :  { %v34_v5 = vld [vmem:[%s2555_s0 + $0x30] sm:$0xff]  ;;  %v35_v6 = vld [vmem:[%s2555_s0 + $0x38] sm:$0xff]  ;;  %v36_v7 = vld [vmem:[%s2555_s0 + $0x40] sm:$0xff]  ;;  %vm945_vm8 = vcmask 130048   ;;  %s1681_s21 = smov 48   ;;  %vm1057_vm9 = vcmask 392192  }
   0x4   :  { %v37_v8 = vld [vmem:[%s2555_s0 + $0x48] sm:$0xff]  ;;  %v38_v9 = vld [vmem:[%s2555_s0 + $0x50] sm:$0xff]  ;;  %v39_v10 = vld [vmem:[%s2555_s0 + $0x58] sm:$0xff]  ;;  %vm222_vm0 = vcmp.lt.s32.totalorder %v1796_v50, 7  ;;  %vm255_vm1 = vcmp.lt.s32.totalorder %v1796_v50, 6  ;;  %vm1074_vm10 = vcmask 588800  }
   0x5   :  { %v40_v11 = vld [vmem:[%s2555_s0 + $0x60] sm:$0xff]  ;;  %v41_v12 = vld [vmem:[%s2555_s0 + $0x68] sm:$0xff]  ;;  %v42_v13 = vld [vmem:[%s2555_s0 + $0x70] sm:$0xff]  ;;  %s1682_s25 = smov 32   ;;  %s1686_s28 = smov 96   ;;  %vm1438_vm11 = vcmask 261120  }
   0x6   :  { %64 = vrot.lane.b32.xlu0 %v30_v2, %s1674_s13  ;;  %68 = vrot.lane.b32.xlu1 %v32_v3, %s1674_s13  ;;  %v43_v14 = vld [vmem:[%s2555_s0 + $0x78] sm:$0xff]  ;;  %v28_v15 = vld [vmem:[%s2555_s0] sm:$0xff]  ;;  %s1676_s0 = smov 4   ;;  %vm1441_vm12 = vcmask 523264   ;;  %vm1443_vm13 = vcmask 654336   ;;  %vm1445_vm14 = vcmask 785408  }
   0x7   :  { %vm1447_vm15 = vcmask 916480  }
   0xa   :  { %70 = vrot.lane.b32.xlu0 %v33_v4, %s1674_s13  ;;  %72 = vrot.lane.b32.xlu1 %v34_v5, %s1674_s13 }
   0xe   :  { %74 = vrot.lane.b32.xlu0 %v35_v6, %s1674_s13  ;;  %76 = vrot.lane.b32.xlu1 %v36_v7, %s1674_s13 }
  0x12   :  { %78 = vrot.lane.b32.xlu0 %v37_v8, %s1674_s13  ;;  %80 = vrot.lane.b32.xlu1 %v38_v9, %s1674_s13 }
  0x16   :  { %82 = vrot.lane.b32.xlu0 %v39_v10, %s1674_s13  ;;  %84 = vrot.lane.b32.xlu1 %v40_v11, %s1674_s13 }
  0x1a   :  { %86 = vrot.lane.b32.xlu0 %v41_v12, %s1674_s13  ;;  %88 = vrot.lane.b32.xlu1 %v42_v13, %s1674_s13 }
  0x1e   :  { %90 = vrot.lane.b32.xlu0 %v43_v14, %s1674_s13  ;;  %60 = vrot.lane.b32.xlu1 %v28_v15, %s1674_s13  ;;  %s1677_s13 = smov 8  }
  0x74   :  { %v63_v16 = vpop.permute.xlu0 %62  ;;  %v67_v17 = vpop.permute.xlu1 %66 }
  0x75   :  { %v109_v18 = vmax.f32 %v29_v0, %v63_v16  ;;  %v111_v19 = vmax.f32 %v31_v1, %v67_v17 }
  0x77   :  { %142 = vrot.lane.b32.xlu0 %v109_v18, %s1675_s15 }
  0x78   :  { %v65_v20 = vpop.permute.xlu0 %64  ;;  %v69_v21 = vpop.permute.xlu1 %68 }
  0x79   :  { %v110_v22 = vmax.f32 %v30_v2, %v65_v20  ;;  %v112_v23 = vmax.f32 %v32_v3, %v69_v21 }
  0x7b   :  { %146 = vrot.lane.b32.xlu0 %v111_v19, %s1675_s15  ;;  %144 = vrot.lane.b32.xlu1 %v110_v22, %s1675_s15 }
  0x7c   :  { %v71_v24 = vpop.permute.xlu0 %70  ;;  %v73_v25 = vpop.permute.xlu1 %72 }
  0x7d   :  { %v113_v26 = vmax.f32 %v33_v4, %v71_v24  ;;  %v114_v27 = vmax.f32 %v34_v5, %v73_v25 }
  0x7f   :  { %150 = vrot.lane.b32.xlu0 %v113_v26, %s1675_s15  ;;  %148 = vrot.lane.b32.xlu1 %v112_v23, %s1675_s15 }
  0x80   :  { %v75_v28 = vpop.permute.xlu0 %74  ;;  %v77_v29 = vpop.permute.xlu1 %76 }
  0x81   :  { %v1755_v30 = vmax.f32 %v35_v6, %v75_v28  ;;  %v1760_v31 = vmax.f32 %v36_v7, %v77_v29 }
  0x83   :  { %154 = vrot.lane.b32.xlu0 %v1755_v30, %s1675_s15  ;;  %152 = vrot.lane.b32.xlu1 %v114_v27, %s1675_s15 }
  0x84   :  { %v79_v32 = vpop.permute.xlu0 %78  ;;  %v81_v33 = vpop.permute.xlu1 %80 }
  0x85   :  { %v1762_v34 = vmax.f32 %v37_v8, %v79_v32  ;;  %v1768_v35 = vmax.f32 %v38_v9, %v81_v33 }
  0x87   :  { %158 = vrot.lane.b32.xlu0 %v1762_v34, %s1675_s15  ;;  %156 = vrot.lane.b32.xlu1 %v1760_v31, %s1675_s15 }
  0x88   :  { %v83_v36 = vpop.permute.xlu0 %82  ;;  %v85_v37 = vpop.permute.xlu1 %84 }
  0x89   :  { %v1770_v38 = vmax.f32 %v39_v10, %v83_v36  ;;  %v1776_v39 = vmax.f32 %v40_v11, %v85_v37 }
  0x8b   :  { %162 = vrot.lane.b32.xlu0 %v1770_v38, %s1675_s15  ;;  %160 = vrot.lane.b32.xlu1 %v1768_v35, %s1675_s15 }
  0x8c   :  { %v87_v40 = vpop.permute.xlu0 %86  ;;  %v89_v41 = vpop.permute.xlu1 %88 }
  0x8d   :  { %v1778_v42 = vmax.f32 %v41_v12, %v87_v40  ;;  %v1784_v43 = vmax.f32 %v42_v13, %v89_v41 }
  0x8f   :  { %166 = vrot.lane.b32.xlu0 %v1778_v42, %s1675_s15  ;;  %164 = vrot.lane.b32.xlu1 %v1776_v39, %s1675_s15 }
  0x90   :  { %v91_v44 = vpop.permute.xlu0 %90  ;;  %v61_v45 = vpop.permute.xlu1 %60 }
  0x91   :  { %v1786_v46 = vmax.f32 %v43_v14, %v91_v44  ;;  %v1792_v47 = vmax.f32 %v28_v15, %v61_v45 }
  0x93   :  { %170 = vrot.lane.b32.xlu0 %v1786_v46, %s1675_s15  ;;  %168 = vrot.lane.b32.xlu1 %v1784_v43, %s1675_s15 }
  0x97   :  { %140 = vrot.lane.b32.xlu1 %v1792_v47, %s1675_s15 }
  0xe9   :  { %v143_v49 = vpop.permute.xlu0 %142 }
  0xea   :  { %v1798_v51 = vmax.f32 %v109_v18, %v143_v49 }
  0xec   :  { %v205_v56 = vrot.slane %v1798_v51, 1  ;;  %v240_v1 = vrot.slane %v1798_v51, 2 }
  0xed   :  { %v147_v52 = vpop.permute.xlu0 %146  ;;  %v145_v53 = vpop.permute.xlu1 %144 }
  0xee   :  { %v1800_v54 = vmax.f32 %v111_v19, %v147_v52  ;;  %v1802_v55 = vmax.f32 %v110_v22, %v145_v53 }
  0xf0   :  { %v206_v57 = vrot.slane %v1802_v55, 1  ;;  %v207_v58 = vrot.slane %v1800_v54, 1  ;;  %v241_v0 = vrot.slane %v1802_v55, 2  ;;  %v242_v5 = vrot.slane %v1800_v54, 2 }
  0xf1   :  { %v149_v59 = vpop.permute.xlu1 %148  ;;  %v151_v60 = vpop.permute.xlu0 %150 }
  0xf2   :  { %v1808_v61 = vmax.f32 %v112_v23, %v149_v59  ;;  %v236_v62 = vsel %vm222_vm0, %v205_v56, %v206_v57  ;;  %v235_v63 = vsel %vm222_vm0, %v206_v57, %v207_v58  ;;  %v1822_v3 = vmax.f32 %v113_v26, %v151_v60 }
  0xf3   :  { %290 = vrot.lane.b32.xlu0 %v236_v62, %s1676_s0  ;;  %292 = vrot.lane.b32.xlu1 %v235_v63, %s1676_s0  ;;  %v269_v7 = vsel %vm255_vm1, %v240_v1, %v241_v0  ;;  %v268_v11 = vsel %vm255_vm1, %v241_v0, %v242_v5 }
  0xf4   :  { %v208_v2 = vrot.slane %v1808_v61, 1  ;;  %v243_v9 = vrot.slane %v1808_v61, 2  ;;  %v209_v13 = vrot.slane %v1822_v3, 1  ;;  %v244_v17 = vrot.slane %v1822_v3, 2 }
  0xf5   :  { %v153_v4 = vpop.permute.xlu1 %152  ;;  %v155_v10 = vpop.permute.xlu0 %154 }
  0xf6   :  { %v1825_v6 = vmax.f32 %v114_v27, %v153_v4  ;;  %v234_v8 = vsel %vm222_vm0, %v207_v58, %v208_v2  ;;  %v267_v12 = vsel %vm255_vm1, %v242_v5, %v243_v9  ;;  %v1845_v16 = vmax.f32 %v1755_v30, %v155_v10 }
  0xf7   :  { %354 = vrot.lane.b32.xlu0 %v269_v7, %s1677_s13  ;;  %294 = vrot.lane.b32.xlu1 %v234_v8, %s1676_s0  ;;  %v233_v19 = vsel %vm222_vm0, %v208_v2, %v209_v13  ;;  %v266_v23 = vsel %vm255_vm1, %v243_v9, %v244_v17 }
  0xf8   :  { %v210_v14 = vrot.slane %v1825_v6, 1  ;;  %v245_v21 = vrot.slane %v1825_v6, 2  ;;  %v211_v25 = vrot.slane %v1845_v16, 1  ;;  %v246_v29 = vrot.slane %v1845_v16, 2 }
  0xf9   :  { %v157_v15 = vpop.permute.xlu1 %156  ;;  %v159_v22 = vpop.permute.xlu0 %158 }
  0xfa   :  { %v1849_v18 = vmax.f32 %v1760_v31, %v157_v15  ;;  %v232_v20 = vsel %vm222_vm0, %v209_v13, %v210_v14  ;;  %v265_v24 = vsel %vm255_vm1, %v244_v17, %v245_v21  ;;  %v1867_v28 = vmax.f32 %v1762_v34, %v159_v22  ;;  %v12_v22 = vld [vmem:[%s2556_s1 + $0x10] sm:$0xff] }
  0xfb   :  { %356 = vrot.lane.b32.xlu0 %v268_v11, %s1677_s13  ;;  %358 = vrot.lane.b32.xlu1 %v267_v12, %s1677_s13  ;;  %v231_v31 = vsel %vm222_vm0, %v210_v14, %v211_v25  ;;  %v264_v34 = vsel %vm255_vm1, %v245_v21, %v246_v29  ;;  %v11_v21 = vld [vmem:[%s2556_s1 + $0x8] sm:$0xff] }
  0xfc   :  { %v212_v26 = vrot.slane %v1849_v18, 1  ;;  %v247_v33 = vrot.slane %v1849_v18, 2  ;;  %v213_v37 = vrot.slane %v1867_v28, 1  ;;  %v248_v45 = vrot.slane %v1867_v28, 2 }
  0xfd   :  { %v161_v27 = vpop.permute.xlu1 %160  ;;  %v163_v36 = vpop.permute.xlu0 %162 }
  0xfe   :  { %v1871_v30 = vmax.f32 %v1768_v35, %v161_v27  ;;  %v230_v32 = vsel %vm222_vm0, %v211_v25, %v212_v26  ;;  %v263_v35 = vsel %vm255_vm1, %v246_v29, %v247_v33  ;;  %v1889_v44 = vmax.f32 %v1770_v38, %v163_v36  ;;  %v13_v36 = vld [vmem:[%s2556_s1 + $0x18] sm:$0xff] }
  0xff   :  { %296 = vrot.lane.b32.xlu0 %v233_v19, %s1676_s0  ;;  %298 = vrot.lane.b32.xlu1 %v232_v20, %s1676_s0  ;;  %v229_v49 = vsel %vm222_vm0, %v212_v26, %v213_v37  ;;  %v262_v38 = vsel %vm255_vm1, %v247_v33, %v248_v45 }
 0x100   :  { %v214_v40 = vrot.slane %v1871_v30, 1  ;;  %v249_v53 = vrot.slane %v1871_v30, 2  ;;  %v215_v58 = vrot.slane %v1889_v44, 1  ;;  %v250_v63 = vrot.slane %v1889_v44, 2 }
 0x101   :  { %v165_v41 = vpop.permute.xlu1 %164  ;;  %v167_v57 = vpop.permute.xlu0 %166 }
 0x102   :  { %v1893_v48 = vmax.f32 %v1776_v39, %v165_v41  ;;  %v228_v52 = vsel %vm222_vm0, %v213_v37, %v214_v40  ;;  %v261_v39 = vsel %vm255_vm1, %v248_v45, %v249_v53  ;;  %v1911_v62 = vmax.f32 %v1778_v42, %v167_v57 }
 0x103   :  { %360 = vrot.lane.b32.xlu0 %v266_v23, %s1677_s13  ;;  %362 = vrot.lane.b32.xlu1 %v265_v24, %s1677_s13  ;;  %v227_v2 = vsel %vm222_vm0, %v214_v40, %v215_v58  ;;  %v260_v42 = vsel %vm255_vm1, %v249_v53, %v250_v63  ;;  %v1635_v23 = vpack.c.bf16 %v12_v22, %v11_v21 }
 0x104   :  { %v216_v59 = vrot.slane %v1893_v48, 1  ;;  %v251_v5 = vrot.slane %v1893_v48, 2  ;;  %v217_v8 = vrot.slane %v1911_v62, 1  ;;  %v252_v12 = vrot.slane %v1911_v62, 2 }
 0x105   :  { %v169_v60 = vpop.permute.xlu1 %168  ;;  %v171_v7 = vpop.permute.xlu0 %170  ;;  %1636 = vmatprep.subr.bf16.mxu0 %v1635_v23 }
 0x106   :  { %v1915_v0 = vmax.f32 %v1784_v43, %v169_v60  ;;  %v226_v4 = vsel %vm222_vm0, %v215_v58, %v216_v59  ;;  %v259_v43 = vsel %vm255_vm1, %v250_v63, %v251_v5  ;;  %v1933_v11 = vmax.f32 %v1786_v46, %v171_v7  ;;  %1638 = vmatpush3.bf16.msra.mxu0 %v1635_v23 }
 0x107   :  { %300 = vrot.lane.b32.xlu0 %v231_v31, %s1676_s0  ;;  %302 = vrot.lane.b32.xlu1 %v230_v32, %s1676_s0  ;;  %v225_v14 = vsel %vm222_vm0, %v216_v59, %v217_v8  ;;  %v258_v46 = vsel %vm255_vm1, %v251_v5, %v252_v12 }
 0x108   :  { %v218_v9 = vrot.slane %v1915_v0, 1  ;;  %v253_v17 = vrot.slane %v1915_v0, 2  ;;  %v254_v26 = vrot.slane %v1933_v11, 2 }
 0x109   :  { %v141_v10 = vpop.permute.xlu1 %140 }
 0x10a   :  { %v1937_v13 = vmax.f32 %v1792_v47, %v141_v10  ;;  %v224_v15 = vsel %vm222_vm0, %v217_v8, %v218_v9  ;;  %v257_v19 = vsel %vm255_vm1, %v252_v12, %v253_v17  ;;  %v219_v47 = vrot.slane %v1933_v11, 1 }
 0x10b   :  { %364 = vrot.lane.b32.xlu0 %v264_v34, %s1677_s13  ;;  %366 = vrot.lane.b32.xlu1 %v263_v35, %s1677_s13  ;;  %v256_v29 = vsel %vm255_vm1, %v253_v17, %v254_v26  ;;  %v14_v34 = vld [vmem:[%s2556_s1 + $0x20] sm:$0xff] }
 0x10c   :  { %v204_v20 = vrot.slane %v1937_v13, 1  ;;  %v223_v24 = vsel %vm222_vm0, %v218_v9, %v219_v47  ;;  %v239_v27 = vrot.slane %v1937_v13, 2  ;;  %v1639_v35 = vpack.c.bf16 %v14_v34, %v13_v36 }
 0x10e   :  { %v238_v25 = vsel %vm222_vm0, %v219_v47, %v204_v20  ;;  %v271_v31 = vsel %vm255_vm1, %v254_v26, %v239_v27  ;;  %v270_v32 = vsel %vm255_vm1, %v239_v27, %v240_v1  ;;  %v237_v33 = vsel %vm222_vm0, %v204_v20, %v205_v56  ;;  %1640 = vmatprep.subr.bf16.mxu0 %v1639_v35  ;;  %v15_v1 = vld [vmem:[%s2556_s1 + $0x28] sm:$0xf] }
 0x10f   :  { %304 = vrot.lane.b32.xlu0 %v229_v49, %s1676_s0  ;;  %306 = vrot.lane.b32.xlu1 %v228_v52, %s1676_s0 }
 0x110   :  { %1642 = vmatpush3.bf16.msra.mxu0 %v1639_v35 }
 0x111   :  { %1556 = vmatprep.subr.msk.mxu0 %vm610_vm2, %v15_v1 }
 0x113   :  { %368 = vrot.lane.b32.xlu0 %v262_v38, %s1677_s13  ;;  %370 = vrot.lane.b32.xlu1 %v261_v39, %s1677_s13 }
 0x114   :  { %1557 = vmatpush3.msk.msra.mxu0 %vm610_vm2, %v15_v1 }
 0x117   :  { %308 = vrot.lane.b32.xlu0 %v227_v2, %s1676_s0  ;;  %310 = vrot.lane.b32.xlu1 %v226_v4, %s1676_s0 }
 0x11b   :  { %372 = vrot.lane.b32.xlu0 %v260_v42, %s1677_s13  ;;  %374 = vrot.lane.b32.xlu1 %v259_v43, %s1677_s13 }
 0x11f   :  { %312 = vrot.lane.b32.xlu0 %v225_v14, %s1676_s0  ;;  %314 = vrot.lane.b32.xlu1 %v224_v15, %s1676_s0 }
 0x123   :  { %376 = vrot.lane.b32.xlu0 %v258_v46, %s1677_s13  ;;  %378 = vrot.lane.b32.xlu1 %v257_v19, %s1677_s13 }
 0x127   :  { %316 = vrot.lane.b32.xlu0 %v223_v24, %s1676_s0  ;;  %318 = vrot.lane.b32.xlu1 %v238_v25, %s1676_s0 }
 0x12b   :  { %380 = vrot.lane.b32.xlu0 %v256_v29, %s1677_s13  ;;  %382 = vrot.lane.b32.xlu1 %v271_v31, %s1677_s13 }
 0x12f   :  { %352 = vrot.lane.b32.xlu1 %v270_v32, %s1677_s13  ;;  %288 = vrot.lane.b32.xlu0 %v237_v33, %s1676_s0 }
 0x165   :  { %v291_v56 = vpop.permute.xlu0 %290  ;;  %v293_v37 = vpop.permute.xlu1 %292 }
 0x166   :  { %v402_v40 = vsel %vm400_vm3, %v1798_v51, %v291_v56  ;;  %v403_v52 = vsel %vm400_vm3, %v1802_v55, %v293_v37 }
 0x169   :  { %v355_v41 = vpop.permute.xlu0 %354  ;;  %v295_v45 = vpop.permute.xlu1 %294 }
 0x16a   :  { %v1996_v49 = vsel %vm417_vm4, %v402_v40, %v355_v41  ;;  %v404_v51 = vsel %vm400_vm3, %v1800_v54, %v295_v45 }
 0x16b   :  { %448 = vrot.lane.b32.xlu0 %v1996_v49, %s1678_s26 }
 0x16d   :  { %v357_v53 = vpop.permute.xlu0 %356  ;;  %v359_v57 = vpop.permute.xlu1 %358 }
 0x16e   :  { %v2003_v38 = vsel %vm417_vm4, %v403_v52, %v357_v53  ;;  %v2012_v59 = vsel %vm417_vm4, %v404_v51, %v359_v57 }
 0x16f   :  { %491 = vrot.lane.b32.xlu0 %v2003_v38, %s1679_s27  ;;  %450 = vrot.lane.b32.xlu1 %v2003_v38, %s1678_s26 }
 0x171   :  { %v297_v39 = vpop.permute.xlu0 %296  ;;  %v299_v58 = vpop.permute.xlu1 %298 }
 0x172   :  { %v405_v55 = vsel %vm400_vm3, %v1808_v61, %v297_v39  ;;  %v406_v54 = vsel %vm400_vm3, %v1822_v3, %v299_v58 }
 0x173   :  { %452 = vrot.lane.b32.xlu0 %v2012_v59, %s1678_s26  ;;  %493 = vrot.lane.b32.xlu1 %v2012_v59, %s1679_s27 }
 0x175   :  { %v361_v60 = vpop.permute.xlu0 %360  ;;  %v363_v63 = vpop.permute.xlu1 %362 }
 0x176   :  { %v2021_v2 = vsel %vm417_vm4, %v405_v55, %v361_v60  ;;  %v2030_v7 = vsel %vm417_vm4, %v406_v54, %v363_v63 }
 0x177   :  { %495 = vrot.lane.b32.xlu0 %v2021_v2, %s1679_s27  ;;  %454 = vrot.lane.b32.xlu1 %v2021_v2, %s1678_s26 }
 0x179   :  { %v301_v4 = vpop.permute.xlu0 %300  ;;  %v303_v5 = vpop.permute.xlu1 %302 }
 0x17a   :  { %v407_v61 = vsel %vm400_vm3, %v1825_v6, %v301_v4  ;;  %v408_v3 = vsel %vm400_vm3, %v1845_v16, %v303_v5 }
 0x17b   :  { %456 = vrot.lane.b32.xlu0 %v2030_v7, %s1678_s26  ;;  %497 = vrot.lane.b32.xlu1 %v2030_v7, %s1679_s27 }
 0x17d   :  { %v365_v42 = vpop.permute.xlu0 %364  ;;  %v367_v43 = vpop.permute.xlu1 %366 }
 0x17e   :  { %v2039_v8 = vsel %vm417_vm4, %v407_v61, %v365_v42  ;;  %v2048_v12 = vsel %vm417_vm4, %v408_v3, %v367_v43 }
 0x17f   :  { %499 = vrot.lane.b32.xlu0 %v2039_v8, %s1679_s27  ;;  %458 = vrot.lane.b32.xlu1 %v2039_v8, %s1678_s26 }
 0x181   :  { %v305_v9 = vpop.permute.xlu0 %304  ;;  %v307_v10 = vpop.permute.xlu1 %306 }
 0x182   :  { %v409_v6 = vsel %vm400_vm3, %v1849_v18, %v305_v9  ;;  %v410_v16 = vsel %vm400_vm3, %v1867_v28, %v307_v10 }
 0x183   :  { %460 = vrot.lane.b32.xlu0 %v2048_v12, %s1678_s26  ;;  %501 = vrot.lane.b32.xlu1 %v2048_v12, %s1679_s27 }
 0x185   :  { %v369_v14 = vpop.permute.xlu0 %368  ;;  %v371_v15 = vpop.permute.xlu1 %370 }
 0x186   :  { %v2057_v17 = vsel %vm417_vm4, %v409_v6, %v369_v14  ;;  %v2066_v47 = vsel %vm417_vm4, %v410_v16, %v371_v15 }
 0x187   :  { %503 = vrot.lane.b32.xlu0 %v2057_v17, %s1679_s27  ;;  %462 = vrot.lane.b32.xlu1 %v2057_v17, %s1678_s26 }
 0x189   :  { %v309_v46 = vpop.permute.xlu0 %308  ;;  %v311_v19 = vpop.permute.xlu1 %310 }
 0x18a   :  { %v411_v18 = vsel %vm400_vm3, %v1871_v30, %v309_v46  ;;  %v412_v28 = vsel %vm400_vm3, %v1889_v44, %v311_v19 }
 0x18b   :  { %464 = vrot.lane.b32.xlu0 %v2066_v47, %s1678_s26  ;;  %505 = vrot.lane.b32.xlu1 %v2066_v47, %s1679_s27 }
 0x18d   :  { %v373_v20 = vpop.permute.xlu0 %372  ;;  %v375_v21 = vpop.permute.xlu1 %374 }
 0x18e   :  { %v2075_v22 = vsel %vm417_vm4, %v411_v18, %v373_v20  ;;  %v2084_v25 = vsel %vm417_vm4, %v412_v28, %v375_v21 }
 0x18f   :  { %507 = vrot.lane.b32.xlu0 %v2075_v22, %s1679_s27  ;;  %466 = vrot.lane.b32.xlu1 %v2075_v22, %s1678_s26 }
 0x191   :  { %v313_v23 = vpop.permute.xlu0 %312  ;;  %v315_v24 = vpop.permute.xlu1 %314 }
 0x192   :  { %v413_v30 = vsel %vm400_vm3, %v1893_v48, %v313_v23  ;;  %v414_v44 = vsel %vm400_vm3, %v1911_v62, %v315_v24 }
 0x193   :  { %468 = vrot.lane.b32.xlu0 %v2084_v25, %s1678_s26  ;;  %509 = vrot.lane.b32.xlu1 %v2084_v25, %s1679_s27 }
 0x195   :  { %v377_v26 = vpop.permute.xlu0 %376  ;;  %v379_v27 = vpop.permute.xlu1 %378 }
 0x196   :  { %v2093_v29 = vsel %vm417_vm4, %v413_v30, %v377_v26  ;;  %v2102_v33 = vsel %vm417_vm4, %v414_v44, %v379_v27 }
 0x197   :  { %511 = vrot.lane.b32.xlu0 %v2093_v29, %s1679_s27  ;;  %470 = vrot.lane.b32.xlu1 %v2093_v29, %s1678_s26 }
 0x199   :  { %v317_v31 = vpop.permute.xlu0 %316  ;;  %v319_v32 = vpop.permute.xlu1 %318 }
 0x19a   :  { %v415_v48 = vsel %vm400_vm3, %v1915_v0, %v317_v31  ;;  %v416_v62 = vsel %vm400_vm3, %v1933_v11, %v319_v32 }
 0x19b   :  { %472 = vrot.lane.b32.xlu0 %v2102_v33, %s1678_s26  ;;  %513 = vrot.lane.b32.xlu1 %v2102_v33, %s1679_s27 }
 0x19d   :  { %v381_v36 = vpop.permute.xlu0 %380  ;;  %v383_v35 = vpop.permute.xlu1 %382 }
 0x19e   :  { %v432_v34 = vsel %vm417_vm4, %v415_v48, %v381_v36  ;;  %v433_v1 = vsel %vm417_vm4, %v416_v62, %v383_v35 }
 0x19f   :  { %515 = vrot.lane.b32.xlu0 %v432_v34, %s1679_s27  ;;  %474 = vrot.lane.b32.xlu1 %v432_v34, %s1678_s26  ;;  %s1684_s26 = smov 64  }
 0x1a1   :  { %v289_v56 = vpop.permute.xlu0 %288  ;;  %v353_v0 = vpop.permute.xlu1 %352 }
 0x1a2   :  { %v401_v37 = vsel %vm400_vm3, %v1937_v13, %v289_v56 }
 0x1a3   :  { %517 = vrot.lane.b32.xlu1 %v433_v1, %s1679_s27  ;;  %v418_v41 = vsel %vm417_vm4, %v401_v37, %v353_v0 }
 0x1dd   :  { %v449_v40 = vpop.permute.xlu0 %448 }
 0x1de   :  { %v534_v45 = vsel %vm533_vm5, %v418_v41, %v449_v40 }
 0x1e1   :  { %v492_v52 = vpop.permute.xlu0 %491  ;;  %v451_v53 = vpop.permute.xlu1 %450 }
 0x1e2   :  { %v549_v11 = vsel %vm548_vm6, %v534_v45, %v492_v52  ;;  %v535_v57 = vsel %vm533_vm5, %v1996_v49, %v451_v53 }
 0x1e3   :  { %1558 = vmatprep.mubr.msk.f32.mxu0 %vm567_vm7, %v549_v11 }
 0x1e5   :  { %v453_v51 = vpop.permute.xlu0 %452  ;;  %v494_v13 = vpop.permute.xlu1 %493 }
 0x1e6   :  { %v550_v39 = vsel %vm548_vm6, %v535_v57, %v494_v13  ;;  %v536_v58 = vsel %vm533_vm5, %v2003_v38, %v453_v51 }
 0x1e7   :  { %1559 = vmatmul.mubr.msk.f32.vlgmr.msra.gmra.mrb[0].mxu0 %vm567_vm7, %v550_v39 }
 0x1e9   :  { %v496_v55 = vpop.permute.xlu0 %495  ;;  %v455_v60 = vpop.permute.xlu1 %454 }
 0x1ea   :  { %v551_v63 = vsel %vm548_vm6, %v536_v58, %v496_v55  ;;  %v537_v54 = vsel %vm533_vm5, %v2012_v59, %v455_v60 }
 0x1eb   :  { %1561 = vmatprep.mubr.msk.f32.mxu0 %vm567_vm7, %v551_v63 }
 0x1ed   :  { %v457_v4 = vpop.permute.xlu0 %456  ;;  %v498_v49 = vpop.permute.xlu1 %497 }
 0x1ee   :  { %v552_v5 = vsel %vm548_vm6, %v537_v54, %v498_v49  ;;  %v538_v61 = vsel %vm533_vm5, %v2021_v2, %v457_v4 }
 0x1ef   :  { %1562 = vmatmul.mubr.msk.f32.gmra.mrb[2].mxu0 %vm567_vm7, %v552_v5 }
 0x1f1   :  { %v500_v42 = vpop.permute.xlu0 %499  ;;  %v459_v38 = vpop.permute.xlu1 %458 }
 0x1f2   :  { %v553_v43 = vsel %vm548_vm6, %v538_v61, %v500_v42  ;;  %v539_v3 = vsel %vm533_vm5, %v2030_v7, %v459_v38 }
 0x1f3   :  { %1564 = vmatprep.mubr.msk.f32.mxu0 %vm567_vm7, %v553_v43 }
 0x1f5   :  { %v461_v9 = vpop.permute.xlu0 %460  ;;  %v502_v59 = vpop.permute.xlu1 %501 }
 0x1f6   :  { %v554_v10 = vsel %vm548_vm6, %v539_v3, %v502_v59  ;;  %v540_v6 = vsel %vm533_vm5, %v2039_v8, %v461_v9 }
 0x1f7   :  { %1565 = vmatmul.mubr.msk.f32.gmra.mrb[4].mxu0 %vm567_vm7, %v554_v10 }
 0x1f9   :  { %v504_v14 = vpop.permute.xlu0 %503  ;;  %v463_v2 = vpop.permute.xlu1 %462 }
 0x1fa   :  { %v555_v15 = vsel %vm548_vm6, %v540_v6, %v504_v14  ;;  %v541_v16 = vsel %vm533_vm5, %v2048_v12, %v463_v2 }
 0x1fb   :  { %1567 = vmatprep.mubr.msk.f32.mxu0 %vm567_vm7, %v555_v15 }
 0x1fd   :  { %v465_v46 = vpop.permute.xlu0 %464  ;;  %v506_v7 = vpop.permute.xlu1 %505 }
 0x1fe   :  { %v556_v19 = vsel %vm548_vm6, %v541_v16, %v506_v7  ;;  %v542_v18 = vsel %vm533_vm5, %v2057_v17, %v465_v46 }
 0x1ff   :  { %1568 = vmatmul.mubr.msk.f32.gmra.mrb[6].mxu0 %vm567_vm7, %v556_v19 }
 0x201   :  { %v508_v20 = vpop.permute.xlu0 %507  ;;  %v467_v8 = vpop.permute.xlu1 %466 }
 0x202   :  { %v557_v21 = vsel %vm548_vm6, %v542_v18, %v508_v20  ;;  %v543_v28 = vsel %vm533_vm5, %v2066_v47, %v467_v8 }
 0x203   :  { %1570 = vmatprep.mubr.msk.f32.mxu0 %vm567_vm7, %v557_v21 }
 0x205   :  { %v469_v23 = vpop.permute.xlu0 %468  ;;  %v510_v12 = vpop.permute.xlu1 %509 }
 0x206   :  { %v558_v24 = vsel %vm548_vm6, %v543_v28, %v510_v12  ;;  %v544_v30 = vsel %vm533_vm5, %v2075_v22, %v469_v23 }
 0x207   :  { %1571 = vmatmul.mubr.msk.f32.gmra.mrb[8].mxu0 %vm567_vm7, %v558_v24 }
 0x209   :  { %v512_v26 = vpop.permute.xlu0 %511  ;;  %v471_v17 = vpop.permute.xlu1 %470 }
 0x20a   :  { %v559_v27 = vsel %vm548_vm6, %v544_v30, %v512_v26  ;;  %v545_v44 = vsel %vm533_vm5, %v2084_v25, %v471_v17 }
 0x20b   :  { %1573 = vmatprep.mubr.msk.f32.mxu0 %vm567_vm7, %v559_v27 }
 0x20d   :  { %v473_v31 = vpop.permute.xlu0 %472  ;;  %v514_v47 = vpop.permute.xlu1 %513 }
 0x20e   :  { %v560_v32 = vsel %vm548_vm6, %v545_v44, %v514_v47  ;;  %v546_v48 = vsel %vm533_vm5, %v2093_v29, %v473_v31  ;;  %v2180_v29 = vld [vmem:[%s2556_s1] ss:$0 sm:$0xff] }
 0x20f   :  { %1574 = vmatmul.mubr.msk.f32.gmra.mrb[10].mxu0 %vm567_vm7, %v560_v32 }
 0x211   :  { %v516_v36 = vpop.permute.xlu0 %515  ;;  %v475_v22 = vpop.permute.xlu1 %474 }
 0x212   :  { %v561_v34 = vsel %vm548_vm6, %v546_v48, %v516_v36  ;;  %v547_v35 = vsel %vm533_vm5, %v2102_v33, %v475_v22 }
 0x213   :  { %1576 = vmatprep.mubr.msk.f32.mxu0 %vm567_vm7, %v561_v34 }
 0x215   :  { %v518_v62 = vpop.permute.xlu1 %517 }
 0x216   :  { %v562_v25 = vsel %vm548_vm6, %v547_v35, %v518_v62 }
 0x217   :  { %1577 = vmatmul.mubr.msk.f32.gmra.mrb[12].mxu0 %vm567_vm7, %v562_v25 }
 0x2ba   :  { %v1560_v1 = vpop.f32.mrb[0].mxu0 }
 0x2bb   :  { %v2175_v56 = vpop.f32.mrb[1].mxu0  ;;  %v686_v37 = vadd.f32 %v1560_v1, %v2180_v29 }
 0x2bd   :  { %v2184_v33 = vmax.f32 %v686_v37, 0.0 }
 0x2bf   :  { %v764_v57 = vrot.slane %v2184_v33, 1  ;;  %v792_v54 = vrot.slane %v2184_v33, 2 }
 0x2c2   :  { %v1563_v0 = vpop.f32.mrb[2].mxu0 }
 0x2c3   :  { %v696_v40 = vadd.f32 %v1563_v0, %v2180_v29  ;;  %v690_v41 = vpop.f32.mrb[3].mxu0 }
 0x2c4   :  { %v691_v45 = vadd.f32 %v2180_v29, %v690_v41 }
 0x2c5   :  { %v2187_v52 = vmax.f32 %v696_v40, 0.0 }
 0x2c6   :  { %v2189_v53 = vmax.f32 %v691_v45, 0.0  ;;  %v681_v45 = vadd.f32 %v2180_v29, %v2175_v56 }
 0x2c7   :  { %v766_v11 = vrot.slane %v2187_v52, 1  ;;  %v794_v49 = vrot.slane %v2187_v52, 2 }
 0x2c8   :  { %v765_v51 = vrot.slane %v2189_v53, 1  ;;  %v793_v13 = vrot.slane %v2189_v53, 2 }
 0x2ca   :  { %v1566_v39 = vpop.f32.mrb[4].mxu0  ;;  %v788_v58 = vsel %vm222_vm0, %v764_v57, %v765_v51  ;;  %v787_v55 = vsel %vm222_vm0, %v765_v51, %v766_v11  ;;  %v816_v42 = vsel %vm255_vm1, %v792_v54, %v793_v13  ;;  %v815_v59 = vsel %vm255_vm1, %v793_v13, %v794_v49 }
 0x2cb   :  { %v706_v60 = vadd.f32 %v1566_v39, %v2180_v29  ;;  %835 = vrot.lane.b32.xlu0 %v788_v58, %s1677_s13  ;;  %837 = vrot.lane.b32.xlu1 %v787_v55, %s1677_s13  ;;  %v700_v63 = vpop.f32.mrb[5].mxu0 }
 0x2cc   :  { %v701_v4 = vadd.f32 %v2180_v29, %v700_v63 }
 0x2cd   :  { %v2207_v5 = vmax.f32 %v706_v60, 0.0  ;;  %v2291_v60 = vmax.f32 %v681_v45, 0.0 }
 0x2ce   :  { %v2209_v61 = vmax.f32 %v701_v4, 0.0 }
 0x2cf   :  { %891 = vrot.lane.b32.xlu0 %v816_v42, %s1680_s30  ;;  %v768_v43 = vrot.slane %v2207_v5, 1  ;;  %v796_v15 = vrot.slane %v2207_v5, 2 }
 0x2d0   :  { %v767_v38 = vrot.slane %v2209_v61, 1  ;;  %v795_v3 = vrot.slane %v2209_v61, 2 }
 0x2d2   :  { %v1569_v9 = vpop.f32.mrb[6].mxu0  ;;  %v786_v10 = vsel %vm222_vm0, %v766_v11, %v767_v38  ;;  %v814_v7 = vsel %vm255_vm1, %v794_v49, %v795_v3  ;;  %v785_v19 = vsel %vm222_vm0, %v767_v38, %v768_v43  ;;  %v813_v28 = vsel %vm255_vm1, %v795_v3, %v796_v15 }
 0x2d3   :  { %v716_v6 = vadd.f32 %v1569_v9, %v2180_v29  ;;  %893 = vrot.lane.b32.xlu0 %v815_v59, %s1680_s30  ;;  %839 = vrot.lane.b32.xlu1 %v786_v10, %s1677_s13  ;;  %v710_v14 = vpop.f32.mrb[7].mxu0  ;;  %v763_v9 = vrot.slane %v2291_v60, 1 }
 0x2d4   :  { %v711_v2 = vadd.f32 %v2180_v29, %v710_v14 }
 0x2d5   :  { %v2228_v16 = vmax.f32 %v716_v6, 0.0 }
 0x2d6   :  { %v2230_v46 = vmax.f32 %v711_v2, 0.0 }
 0x2d7   :  { %895 = vrot.lane.b32.xlu1 %v814_v7, %s1680_s30  ;;  %841 = vrot.lane.b32.xlu0 %v785_v19, %s1677_s13  ;;  %v770_v20 = vrot.slane %v2228_v16, 1  ;;  %v798_v26 = vrot.slane %v2228_v16, 2 }
 0x2d8   :  { %v769_v18 = vrot.slane %v2230_v46, 1  ;;  %v797_v8 = vrot.slane %v2230_v46, 2 }
 0x2da   :  { %v1572_v21 = vpop.f32.mrb[8].mxu0  ;;  %v784_v23 = vsel %vm222_vm0, %v768_v43, %v769_v18  ;;  %v812_v44 = vsel %vm255_vm1, %v796_v15, %v797_v8  ;;  %v783_v31 = vsel %vm222_vm0, %v769_v18, %v770_v20  ;;  %v811_v22 = vsel %vm255_vm1, %v797_v8, %v798_v26  ;;  %v16_v18 = vld [vmem:[%s2556_s1 + $0x30] sm:$0xff] }
 0x2db   :  { %v726_v12 = vadd.f32 %v1572_v21, %v2180_v29  ;;  %897 = vrot.lane.b32.xlu0 %v813_v28, %s1680_s30  ;;  %843 = vrot.lane.b32.xlu1 %v784_v23, %s1677_s13  ;;  %v720_v24 = vpop.f32.mrb[9].mxu0  ;;  %v18_v21 = vld [vmem:[%s2556_s1 + $0x40] sm:$0xff]  ;;  %v19_v28 = vld [vmem:[%s2556_s1 + $0x48] sm:$0xff] }
 0x2dc   :  { %v721_v30 = vadd.f32 %v2180_v29, %v720_v24  ;;  %v1647_v23 = vpack.c.bf16 %v19_v28, %v18_v21 }
 0x2dd   :  { %v2250_v17 = vmax.f32 %v726_v12, 0.0 }
 0x2de   :  { %v2252_v27 = vmax.f32 %v721_v30, 0.0  ;;  %v20_v30 = vld [vmem:[%s2556_s1 + $0x50] sm:$0xff] }
 0x2df   :  { %899 = vrot.lane.b32.xlu1 %v812_v44, %s1680_s30  ;;  %845 = vrot.lane.b32.xlu0 %v783_v31, %s1677_s13  ;;  %v772_v32 = vrot.slane %v2250_v17, 1  ;;  %v800_v1 = vrot.slane %v2250_v17, 2  ;;  %v791_v44 = vrot.slane %v2291_v60, 2 }
 0x2e0   :  { %v771_v47 = vrot.slane %v2252_v27, 1  ;;  %v799_v48 = vrot.slane %v2252_v27, 2 }
 0x2e2   :  { %v1575_v36 = vpop.f32.mrb[10].mxu0  ;;  %v782_v34 = vsel %vm222_vm0, %v770_v20, %v771_v47  ;;  %v810_v40 = vsel %vm255_vm1, %v798_v26, %v799_v48  ;;  %v781_v41 = vsel %vm222_vm0, %v771_v47, %v772_v32  ;;  %v809_v58 = vsel %vm255_vm1, %v799_v48, %v800_v1  ;;  %v17_v20 = vld [vmem:[%s2556_s1 + $0x38] sm:$0xff] }
 0x2e3   :  { %v736_v35 = vadd.f32 %v1575_v36, %v2180_v29  ;;  %901 = vrot.lane.b32.xlu0 %v811_v22, %s1680_s30  ;;  %847 = vrot.lane.b32.xlu1 %v782_v34, %s1677_s13  ;;  %v730_v62 = vpop.f32.mrb[11].mxu0  ;;  %v1643_v8 = vpack.c.bf16 %v17_v20, %v16_v18  ;;  %v21_v26 = vld [vmem:[%s2556_s1 + $0x58] sm:$0xff]  ;;  %v817_v48 = vsel %vm255_vm1, %v791_v44, %v792_v54  ;;  %v22_v36 = vld [vmem:[%s2556_s1 + $0x60] sm:$0xff] }
 0x2e4   :  { %v731_v25 = vadd.f32 %v2180_v29, %v730_v62  ;;  %v1651_v31 = vpack.c.bf16 %v21_v26, %v20_v30  ;;  %v24_v34 = vld [vmem:[%s2556_s1 + $0x70] sm:$0xff] }
 0x2e5   :  { %v2272_v37 = vmax.f32 %v736_v35, 0.0  ;;  %1644 = vmatprep.subr.bf16.mxu1 %v1643_v8 }
 0x2e6   :  { %v2274_v0 = vmax.f32 %v731_v25, 0.0  ;;  %1646 = vmatpush3.bf16.msra.mxu1 %v1643_v8 }
 0x2e7   :  { %903 = vrot.lane.b32.xlu1 %v810_v40, %s1680_s30  ;;  %849 = vrot.lane.b32.xlu0 %v781_v41, %s1677_s13  ;;  %v774_v51 = vrot.slane %v2272_v37, 1  ;;  %v802_v42 = vrot.slane %v2272_v37, 2 }
 0x2e8   :  { %v773_v11 = vrot.slane %v2274_v0, 1  ;;  %v801_v13 = vrot.slane %v2274_v0, 2  ;;  %1648 = vmatprep.subr.bf16.mxu1 %v1647_v23 }
 0x2ea   :  { %v1578_v39 = vpop.f32.mrb[12].mxu0  ;;  %v780_v55 = vsel %vm222_vm0, %v772_v32, %v773_v11  ;;  %v808_v43 = vsel %vm255_vm1, %v800_v1, %v801_v13  ;;  %v779_v3 = vsel %vm222_vm0, %v773_v11, %v774_v51  ;;  %v807_v14 = vsel %vm255_vm1, %v801_v13, %v802_v42  ;;  %1650 = vmatpush3.bf16.msra.mxu1 %v1647_v23 }
 0x2eb   :  { %v746_v56 = vadd.f32 %v1578_v39, %v2180_v29  ;;  %905 = vrot.lane.b32.xlu0 %v809_v58, %s1680_s30  ;;  %851 = vrot.lane.b32.xlu1 %v780_v55, %s1677_s13  ;;  %v740_v63 = vpop.f32.mrb[13].mxu0  ;;  %v789_v32 = vsel %vm222_vm0, %v763_v9, %v764_v57  ;;  %v23_v57 = vld [vmem:[%s2556_s1 + $0x68] sm:$0xff] }
 0x2ec   :  { %v741_v4 = vadd.f32 %v2180_v29, %v740_v63  ;;  %1652 = vmatprep.subr.bf16.mxu1 %v1651_v31  ;;  %v1655_v22 = vpack.c.bf16 %v23_v57, %v22_v36 }
 0x2ed   :  { %v2297_v49 = vmax.f32 %v746_v56, 0.0 }
 0x2ee   :  { %v2300_v38 = vmax.f32 %v741_v4, 0.0  ;;  %1654 = vmatpush3.bf16.msra.mxu1 %v1651_v31 }
 0x2ef   :  { %v776_v59 = vrot.slane %v2297_v49, 1  ;;  %907 = vrot.lane.b32.xlu1 %v808_v43, %s1680_s30  ;;  %853 = vrot.lane.b32.xlu0 %v779_v3, %s1677_s13  ;;  %v804_v2 = vrot.slane %v2297_v49, 2 }
 0x2f0   :  { %v775_v6 = vrot.slane %v2300_v38, 1  ;;  %v803_v15 = vrot.slane %v2300_v38, 2  ;;  %1656 = vmatprep.subr.bf16.mxu1 %v1655_v22 }
 0x2f1   :  { %v790_v10 = vsel %vm222_vm0, %v776_v59, %v763_v9  ;;  %v818_v47 = vsel %vm255_vm1, %v804_v2, %v791_v44 }
 0x2f2   :  { %v778_v7 = vsel %vm222_vm0, %v774_v51, %v775_v6  ;;  %v777_v19 = vsel %vm222_vm0, %v775_v6, %v776_v59  ;;  %v806_v12 = vsel %vm255_vm1, %v802_v42, %v803_v15  ;;  %v805_v24 = vsel %vm255_vm1, %v803_v15, %v804_v2  ;;  %1658 = vmatpush3.bf16.msra.mxu1 %v1655_v22 }
 0x2f3   :  { %909 = vrot.lane.b32.xlu0 %v807_v14, %s1680_s30  ;;  %859 = vrot.lane.b32.xlu1 %v790_v10, %s1677_s13 }
 0x2f4   :  { %1595 = vmatprep.subr.mxu1 %v24_v34 }
 0x2f6   :  { %1596 = vmatpush3.msra.mxu1 %v24_v34 }
 0x2f7   :  { %855 = vrot.lane.b32.xlu1 %v778_v7, %s1677_s13  ;;  %857 = vrot.lane.b32.xlu0 %v777_v19, %s1677_s13 }
 0x2fb   :  { %911 = vrot.lane.b32.xlu1 %v806_v12, %s1680_s30  ;;  %913 = vrot.lane.b32.xlu0 %v805_v24, %s1680_s30 }
 0x2ff   :  { %915 = vrot.lane.b32.xlu1 %v818_v47, %s1680_s30  ;;  %833 = vrot.lane.b32.xlu0 %v789_v32, %s1677_s13 }
 0x303   :  { %889 = vrot.lane.b32.xlu1 %v817_v48, %s1680_s30 }
 0x33d   :  { %v836_v50 = vpop.permute.xlu0 %835  ;;  %v838_v35 = vpop.permute.xlu1 %837 }
 0x33e   :  { %v932_v54 = vsel %vm417_vm4, %v2184_v33, %v836_v50  ;;  %v933_v1 = vsel %vm417_vm4, %v2189_v53, %v838_v35 }
 0x341   :  { %v892_v62 = vpop.permute.xlu0 %891 }
 0x342   :  { %v2375_v25 = vsel %vm945_vm8, %v932_v54, %v892_v62 }
 0x343   :  { %972 = vrot.lane.b32.xlu0 %v2375_v25, %s1679_s27 }
 0x345   :  { %v894_v40 = vpop.permute.xlu0 %893  ;;  %v840_v41 = vpop.permute.xlu1 %839 }
 0x346   :  { %v2382_v45 = vsel %vm945_vm8, %v933_v1, %v894_v40  ;;  %v934_v33 = vsel %vm417_vm4, %v2187_v52, %v840_v41 }
 0x347   :  { %1009 = vrot.lane.b32.xlu0 %v2382_v45, %s1681_s21  ;;  %974 = vrot.lane.b32.xlu1 %v2382_v45, %s1679_s27 }
 0x349   :  { %v842_v11 = vpop.permute.xlu0 %841  ;;  %v896_v51 = vpop.permute.xlu1 %895 }
 0x34a   :  { %v2391_v13 = vsel %vm945_vm8, %v934_v33, %v896_v51  ;;  %v935_v53 = vsel %vm417_vm4, %v2209_v61, %v842_v11 }
 0x34b   :  { %976 = vrot.lane.b32.xlu0 %v2391_v13, %s1679_s27  ;;  %1011 = vrot.lane.b32.xlu1 %v2391_v13, %s1681_s21 }
 0x34d   :  { %v898_v39 = vpop.permute.xlu0 %897  ;;  %v844_v58 = vpop.permute.xlu1 %843 }
 0x34e   :  { %v2400_v55 = vsel %vm945_vm8, %v935_v53, %v898_v39  ;;  %v936_v52 = vsel %vm417_vm4, %v2207_v5, %v844_v58 }
 0x34f   :  { %1013 = vrot.lane.b32.xlu0 %v2400_v55, %s1681_s21  ;;  %978 = vrot.lane.b32.xlu1 %v2400_v55, %s1679_s27 }
 0x351   :  { %v846_v56 = vpop.permute.xlu0 %845  ;;  %v900_v63 = vpop.permute.xlu1 %899 }
 0x352   :  { %v2409_v4 = vsel %vm945_vm8, %v936_v52, %v900_v63  ;;  %v937_v61 = vsel %vm417_vm4, %v2230_v46, %v846_v56 }
 0x353   :  { %980 = vrot.lane.b32.xlu0 %v2409_v4, %s1679_s27  ;;  %1015 = vrot.lane.b32.xlu1 %v2409_v4, %s1681_s21 }
 0x355   :  { %v902_v42 = vpop.permute.xlu0 %901  ;;  %v848_v43 = vpop.permute.xlu1 %847 }
 0x356   :  { %v2418_v3 = vsel %vm945_vm8, %v937_v61, %v902_v42  ;;  %v938_v5 = vsel %vm417_vm4, %v2228_v16, %v848_v43 }
 0x357   :  { %1017 = vrot.lane.b32.xlu0 %v2418_v3, %s1681_s21  ;;  %982 = vrot.lane.b32.xlu1 %v2418_v3, %s1679_s27 }
 0x359   :  { %v850_v9 = vpop.permute.xlu0 %849  ;;  %v904_v59 = vpop.permute.xlu1 %903 }
 0x35a   :  { %v2427_v10 = vsel %vm945_vm8, %v938_v5, %v904_v59  ;;  %v939_v46 = vsel %vm417_vm4, %v2252_v27, %v850_v9 }
 0x35b   :  { %984 = vrot.lane.b32.xlu0 %v2427_v10, %s1679_s27  ;;  %1019 = vrot.lane.b32.xlu1 %v2427_v10, %s1681_s21 }
 0x35d   :  { %v906_v6 = vpop.permute.xlu0 %905  ;;  %v852_v14 = vpop.permute.xlu1 %851 }
 0x35e   :  { %v2436_v2 = vsel %vm945_vm8, %v939_v46, %v906_v6  ;;  %v940_v16 = vsel %vm417_vm4, %v2250_v17, %v852_v14 }
 0x35f   :  { %1021 = vrot.lane.b32.xlu0 %v2436_v2, %s1681_s21  ;;  %986 = vrot.lane.b32.xlu1 %v2436_v2, %s1679_s27 }
 0x361   :  { %v854_v15 = vpop.permute.xlu0 %853  ;;  %v908_v7 = vpop.permute.xlu1 %907 }
 0x362   :  { %v2445_v19 = vsel %vm945_vm8, %v940_v16, %v908_v7  ;;  %v941_v27 = vsel %vm417_vm4, %v2274_v0, %v854_v15 }
 0x363   :  { %988 = vrot.lane.b32.xlu0 %v2445_v19, %s1679_s27  ;;  %1023 = vrot.lane.b32.xlu1 %v2445_v19, %s1681_s21 }
 0x365   :  { %v910_v18 = vpop.permute.xlu0 %909  ;;  %v860_v20 = vpop.permute.xlu1 %859 }
 0x366   :  { %v2454_v8 = vsel %vm945_vm8, %v941_v27, %v910_v18 }
 0x367   :  { %1025 = vrot.lane.b32.xlu0 %v2454_v8, %s1681_s21  ;;  %990 = vrot.lane.b32.xlu1 %v2454_v8, %s1679_s27 }
 0x369   :  { %v858_v17 = vpop.permute.xlu0 %857  ;;  %v856_v21 = vpop.permute.xlu1 %855 }
 0x36a   :  { %v942_v28 = vsel %vm417_vm4, %v2272_v37, %v856_v21  ;;  %v943_v24 = vsel %vm417_vm4, %v2300_v38, %v858_v17  ;;  %v944_v37 = vsel %vm417_vm4, %v2297_v49, %v860_v20  ;;  %v25_v17 = vld [vmem:[%s2556_s1 + $0x78] sm:$0xff] }
 0x36b   :  { %1615 = vmatprep.subr.mxu0 %v25_v17  ;;  %1659 = vmatprep.subr.mxu1 %v25_v17 }
 0x36c   :  { %1616 = vmatpush3.msra.mxu0 %v25_v17 }
 0x36d   :  { %v912_v23 = vpop.permute.xlu1 %911  ;;  %v914_v0 = vpop.permute.xlu0 %913 }
 0x36e   :  { %v2463_v12 = vsel %vm945_vm8, %v942_v28, %v912_v23  ;;  %v958_v30 = vsel %vm945_vm8, %v943_v24, %v914_v0 }
 0x36f   :  { %992 = vrot.lane.b32.xlu0 %v2463_v12, %s1679_s27  ;;  %1027 = vrot.lane.b32.xlu1 %v2463_v12, %s1681_s21 }
 0x371   :  { %v916_v26 = vpop.permute.xlu1 %915  ;;  %v834_v31 = vpop.permute.xlu0 %833 }
 0x372   :  { %v959_v44 = vsel %vm945_vm8, %v944_v37, %v916_v26  ;;  %v931_v32 = vsel %vm417_vm4, %v2291_v60, %v834_v31 }
 0x373   :  { %1029 = vrot.lane.b32.xlu0 %v958_v30, %s1681_s21  ;;  %994 = vrot.lane.b32.xlu1 %v958_v30, %s1679_s27  ;;  %s1685_s27 = smov 112  }
 0x375   :  { %v890_v47 = vpop.permute.xlu1 %889 }
 0x376   :  { %v946_v48 = vsel %vm945_vm8, %v931_v32, %v890_v47 }
 0x377   :  { %1031 = vrot.lane.b32.xlu1 %v959_v44, %s1681_s21  ;;  %1071 = vrot.lane.b32.xlu0 %v2180_v29, %s1675_s15 }
 0x3b5   :  { %v973_v38 = vpop.permute.xlu0 %972 }
 0x3b6   :  { %v1045_v36 = vsel %vm548_vm6, %v946_v48, %v973_v38 }
 0x3b9   :  { %v1010_v49 = vpop.permute.xlu0 %1009  ;;  %v975_v57 = vpop.permute.xlu1 %974 }
 0x3ba   :  { %v1058_v22 = vsel %vm1057_vm9, %v1045_v36, %v1010_v49  ;;  %v1046_v29 = vsel %vm548_vm6, %v2375_v25, %v975_v57 }
 0x3bb   :  { %1597 = vmatprep.mubr.msk.f32.mxu1 %vm1074_vm10, %v1058_v22 }
 0x3bd   :  { %v977_v34 = vpop.permute.xlu0 %976  ;;  %v1012_v50 = vpop.permute.xlu1 %1011 }
 0x3be   :  { %v1059_v54 = vsel %vm1057_vm9, %v1046_v29, %v1012_v50  ;;  %v1047_v60 = vsel %vm548_vm6, %v2382_v45, %v977_v34 }
 0x3bf   :  { %1598 = vmatmul.mubr.msk.f32.vlgmr.msra.gmra.mrb[0].mxu1 %vm1074_vm10, %v1059_v54 }
 0x3c0   :  { %1660 = vmatpush3.msra.mxu1 %v25_v17 }
 0x3c1   :  { %v1014_v35 = vpop.permute.xlu0 %1013  ;;  %v979_v62 = vpop.permute.xlu1 %978 }
 0x3c2   :  { %v1060_v1 = vsel %vm1057_vm9, %v1047_v60, %v1014_v35  ;;  %v1048_v40 = vsel %vm548_vm6, %v2391_v13, %v979_v62 }
 0x3c3   :  { %1600 = vmatprep.mubr.msk.f32.mxu1 %vm1074_vm10, %v1060_v1 }
 0x3c5   :  { %v981_v41 = vpop.permute.xlu0 %980  ;;  %v1016_v25 = vpop.permute.xlu1 %1015 }
 0x3c6   :  { %v1061_v33 = vsel %vm1057_vm9, %v1048_v40, %v1016_v25  ;;  %v1049_v11 = vsel %vm548_vm6, %v2400_v55, %v981_v41 }
 0x3c7   :  { %1601 = vmatmul.mubr.msk.f32.gmra.mrb[2].mxu1 %vm1074_vm10, %v1061_v33 }
 0x3c9   :  { %v1018_v51 = vpop.permute.xlu0 %1017  ;;  %v983_v45 = vpop.permute.xlu1 %982 }
 0x3ca   :  { %v1062_v53 = vsel %vm1057_vm9, %v1049_v11, %v1018_v51  ;;  %v1050_v39 = vsel %vm548_vm6, %v2409_v4, %v983_v45 }
 0x3cb   :  { %1603 = vmatprep.mubr.msk.f32.mxu1 %vm1074_vm10, %v1062_v53 }
 0x3cd   :  { %v985_v58 = vpop.permute.xlu0 %984  ;;  %v1020_v13 = vpop.permute.xlu1 %1019 }
 0x3ce   :  { %v1063_v52 = vsel %vm1057_vm9, %v1050_v39, %v1020_v13  ;;  %v1051_v56 = vsel %vm548_vm6, %v2418_v3, %v985_v58  ;;  %v1482_v58 = vld [vmem:[%s2556_s1 + $0x1] ss:$0 sm:$0xff]  ;;  %s1683_s1 = smov 80  }
 0x3cf   :  { %1604 = vmatmul.mubr.msk.f32.gmra.mrb[4].mxu1 %vm1074_vm10, %v1063_v52 }
 0x3d1   :  { %v1022_v63 = vpop.permute.xlu0 %1021  ;;  %v987_v55 = vpop.permute.xlu1 %986 }
 0x3d2   :  { %v1064_v61 = vsel %vm1057_vm9, %v1051_v56, %v1022_v63  ;;  %v1052_v42 = vsel %vm548_vm6, %v2427_v10, %v987_v55 }
 0x3d3   :  { %1606 = vmatprep.mubr.msk.f32.mxu1 %vm1074_vm10, %v1064_v61 }
 0x3d5   :  { %v989_v43 = vpop.permute.xlu0 %988  ;;  %v1024_v4 = vpop.permute.xlu1 %1023 }
 0x3d6   :  { %v1065_v5 = vsel %vm1057_vm9, %v1052_v42, %v1024_v4  ;;  %v1053_v9 = vsel %vm548_vm6, %v2436_v2, %v989_v43 }
 0x3d7   :  { %1607 = vmatmul.mubr.msk.f32.gmra.mrb[6].mxu1 %vm1074_vm10, %v1065_v5 }
 0x3d9   :  { %v1026_v59 = vpop.permute.xlu0 %1025  ;;  %v991_v46 = vpop.permute.xlu1 %990 }
 0x3da   :  { %v1066_v3 = vsel %vm1057_vm9, %v1053_v9, %v1026_v59  ;;  %v1054_v6 = vsel %vm548_vm6, %v2445_v19, %v991_v46 }
 0x3db   :  { %1609 = vmatprep.mubr.msk.f32.mxu1 %vm1074_vm10, %v1066_v3 }
 0x3e1   :  { %v993_v14 = vpop.permute.xlu0 %992  ;;  %v1028_v10 = vpop.permute.xlu1 %1027 }
 0x3e2   :  { %v1067_v16 = vsel %vm1057_vm9, %v1054_v6, %v1028_v10  ;;  %v1055_v15 = vsel %vm548_vm6, %v2454_v8, %v993_v14 }
 0x3e3   :  { %1610 = vmatmul.mubr.msk.f32.gmra.mrb[8].mxu1 %vm1074_vm10, %v1067_v16 }
 0x3e5   :  { %v1030_v7 = vpop.permute.xlu0 %1029  ;;  %v995_v2 = vpop.permute.xlu1 %994 }
 0x3e6   :  { %v1068_v27 = vsel %vm1057_vm9, %v1055_v15, %v1030_v7  ;;  %v1056_v18 = vsel %vm548_vm6, %v2463_v12, %v995_v2 }
 0x3e7   :  { %1612 = vmatprep.mubr.msk.f32.mxu1 %vm1074_vm10, %v1068_v27 }
 0x3e9   :  { %v1032_v20 = vpop.permute.xlu1 %1031  ;;  %v1072_v8 = vpop.permute.xlu0 %1071 }
 0x3ea   :  { %v1069_v19 = vsel %vm1057_vm9, %v1056_v18, %v1032_v20 }
 0x3eb   :  { %1613 = vmatmul.mubr.msk.f32.gmra.mrb[10].mxu1 %vm1074_vm10, %v1069_v19 }
 0x492   :  { %v1599_v21 = vpop.f32.mrb[0].mxu1 }
 0x493   :  { %v1183_v28 = vadd.f32 %v1599_v21, %v1072_v8  ;;  %v1177_v23 = vpop.f32.mrb[1].mxu1 }
 0x494   :  { %v1178_v0 = vadd.f32 %v1177_v23, %v1072_v8 }
 0x495   :  { %v1237_v12 = vmax.f32 %v1183_v28, 0.0 }
 0x496   :  { %v1236_v24 = vmax.f32 %v1178_v0, 0.0 }
 0x498   :  { %1617 = vmatprep.mubr.msk.f32.mxu0 %vm417_vm4, %v1236_v24 }
 0x499   :  { %1618 = vmatmul.mubr.msk.f32.vlgmr.msra.gmra.mrb[14].mxu0 %vm417_vm4, %v1237_v12 }
 0x49a   :  { %v1602_v30 = vpop.f32.mrb[2].mxu1 }
 0x49b   :  { %v1193_v26 = vadd.f32 %v1602_v30, %v1072_v8  ;;  %v1187_v37 = vpop.f32.mrb[3].mxu1 }
 0x49c   :  { %v1188_v44 = vadd.f32 %v1187_v37, %v1072_v8 }
 0x49d   :  { %v1239_v47 = vmax.f32 %v1193_v26, 0.0 }
 0x49e   :  { %v1238_v31 = vmax.f32 %v1188_v44, 0.0 }
 0x4a0   :  { %1620 = vmatprep.mubr.msk.f32.mxu0 %vm417_vm4, %v1238_v31 }
 0x4a1   :  { %1621 = vmatmul.mubr.msk.f32.gmra.mrb[16].mxu0 %vm417_vm4, %v1239_v47 }
 0x4a2   :  { %v1605_v38 = vpop.f32.mrb[4].mxu1 }
 0x4a3   :  { %v1203_v32 = vadd.f32 %v1605_v38, %v1072_v8  ;;  %v1197_v48 = vpop.f32.mrb[5].mxu1 }
 0x4a4   :  { %v1198_v36 = vadd.f32 %v1197_v48, %v1072_v8 }
 0x4a5   :  { %v1241_v57 = vmax.f32 %v1203_v32, 0.0 }
 0x4a6   :  { %v1240_v49 = vmax.f32 %v1198_v36, 0.0 }
 0x4a8   :  { %1623 = vmatprep.mubr.msk.f32.mxu0 %vm417_vm4, %v1240_v49 }
 0x4a9   :  { %1624 = vmatmul.mubr.msk.f32.gmra.mrb[18].mxu0 %vm417_vm4, %v1241_v57 }
 0x4aa   :  { %v1608_v22 = vpop.f32.mrb[6].mxu1 }
 0x4ab   :  { %v1213_v29 = vadd.f32 %v1608_v22, %v1072_v8  ;;  %v1207_v34 = vpop.f32.mrb[7].mxu1 }
 0x4ac   :  { %v1208_v50 = vadd.f32 %v1207_v34, %v1072_v8 }
 0x4ad   :  { %v1243_v60 = vmax.f32 %v1213_v29, 0.0 }
 0x4ae   :  { %v1242_v54 = vmax.f32 %v1208_v50, 0.0 }
 0x4b0   :  { %1626 = vmatprep.mubr.msk.f32.mxu0 %vm417_vm4, %v1242_v54 }
 0x4b1   :  { %1627 = vmatmul.mubr.msk.f32.gmra.mrb[20].mxu0 %vm417_vm4, %v1243_v60 }
 0x4b6   :  { %v1611_v35 = vpop.f32.mrb[8].mxu1 }
 0x4b7   :  { %v1223_v62 = vadd.f32 %v1611_v35, %v1072_v8  ;;  %v1217_v1 = vpop.f32.mrb[9].mxu1 }
 0x4b8   :  { %v1218_v40 = vadd.f32 %v1217_v1, %v1072_v8 }
 0x4b9   :  { %v1245_v25 = vmax.f32 %v1223_v62, 0.0 }
 0x4ba   :  { %v1244_v41 = vmax.f32 %v1218_v40, 0.0 }
 0x4bc   :  { %1629 = vmatprep.mubr.msk.f32.mxu1 %vm417_vm4, %v1244_v41 }
 0x4bd   :  { %1630 = vmatmul.mubr.msk.f32.vlgmr.msra.gmra.mrb[12].mxu1 %vm417_vm4, %v1245_v25 }
 0x4be   :  { %v1614_v33 = vpop.f32.mrb[10].mxu1 }
 0x4bf   :  { %v1233_v11 = vadd.f32 %v1614_v33, %v1072_v8  ;;  %v1227_v51 = vpop.f32.mrb[11].mxu1 }
 0x4c0   :  { %v1228_v45 = vadd.f32 %v1227_v51, %v1072_v8 }
 0x4c1   :  { %v1247_v39 = vmax.f32 %v1233_v11, 0.0 }
 0x4c2   :  { %v1246_v53 = vmax.f32 %v1228_v45, 0.0 }
 0x4c4   :  { %1632 = vmatprep.mubr.msk.f32.mxu1 %vm417_vm4, %v1246_v53 }
 0x4c5   :  { %1633 = vmatmul.mubr.msk.f32.gmra.mrb[14].mxu1 %vm417_vm4, %v1247_v39 }
 0x56c   :  { %v1619_v13 = vpop.f32.mrb[14].mxu0 }
 0x56d   :  { %v1360_v52 = vadd.f32 %v1619_v13, %v1482_v58  ;;  %v1354_v56 = vpop.f32.mrb[15].mxu0 }
 0x56e   :  { %v1355_v63 = vadd.f32 %v1482_v58, %v1354_v56 }
 0x56f   :  { %1410 = vrot.lane.b32.xlu1 %v1360_v52, %s1680_s30 }
 0x574   :  { %v1622_v55 = vpop.f32.mrb[16].mxu0 }
 0x575   :  { %v1370_v61 = vadd.f32 %v1622_v55, %v1482_v58  ;;  %v1364_v42 = vpop.f32.mrb[17].mxu0 }
 0x576   :  { %v1365_v43 = vadd.f32 %v1482_v58, %v1364_v42 }
 0x577   :  { %1418 = vrot.lane.b32.xlu1 %v1370_v61, %s1681_s21 }
 0x578   :  { %1414 = vrot.lane.b32.xlu0 %v1365_v43, %s1682_s25 }
 0x57c   :  { %v1625_v4 = vpop.f32.mrb[18].mxu0 }
 0x57d   :  { %v1374_v5 = vpop.f32.mrb[19].mxu0 }
 0x584   :  { %v1628_v9 = vpop.f32.mrb[20].mxu0 }
 0x585   :  { %v1382_v59 = vpop.f32.mrb[21].mxu0 }
 0x590   :  { %v1631_v3 = vpop.f32.mrb[12].mxu1 }
 0x591   :  { %v1396_v46 = vadd.f32 %v1631_v3, %v1482_v58  ;;  %v1390_v6 = vpop.f32.mrb[13].mxu1 }
 0x592   :  { %v1391_v14 = vadd.f32 %v1482_v58, %v1390_v6 }
 0x593   :  { %1426 = vrot.lane.b32.xlu1 %v1396_v46, %s1683_s1 }
 0x594   :  { %1422 = vrot.lane.b32.xlu0 %v1391_v14, %s1684_s26 }
 0x598   :  { %v1634_v10 = vpop.f32.mrb[14].mxu1 }
 0x599   :  { %v1406_v16 = vadd.f32 %v1634_v10, %v1482_v58  ;;  %v1400_v15 = vpop.f32.mrb[15].mxu1 }
 0x59a   :  { %v1401_v7 = vadd.f32 %v1482_v58, %v1400_v15 }
 0x59b   :  { %1434 = vrot.lane.b32.xlu1 %v1406_v16, %s1685_s27 }
 0x59c   :  { %1430 = vrot.lane.b32.xlu0 %v1401_v7, %s1686_s28 }
 0x5e1   :  { %v1411_v2 = vpop.permute.xlu1 %1410 }
 0x5e2   :  { %v1437_v18 = vsel %vm945_vm8, %v1355_v63, %v1411_v2 }
 0x5e9   :  { %v1419_v20 = vpop.permute.xlu1 %1418 }
 0x5ea   :  { %v1415_v27 = vpop.permute.xlu0 %1414 }
 0x5eb   :  { %v1439_v19 = vsel %vm1438_vm11, %v1437_v18, %v1415_v27 }
 0x5ec   :  { %v1440_v8 = vsel %vm1057_vm9, %v1439_v19, %v1419_v20 }
 0x605   :  { %v1427_v21 = vpop.permute.xlu1 %1426 }
 0x606   :  { %v1423_v17 = vpop.permute.xlu0 %1422 }
 0x607   :  { %v1442_v28 = vsel %vm1441_vm12, %v1440_v8, %v1423_v17 }
 0x608   :  { %v1444_v0 = vsel %vm1443_vm13, %v1442_v28, %v1427_v21 }
 0x60d   :  { %v1435_v24 = vpop.permute.xlu1 %1434 }
 0x60e   :  { %v1431_v23 = vpop.permute.xlu0 %1430 }
 0x60f   :  { %v1446_v12 = vsel %vm1445_vm14, %v1444_v0, %v1431_v23 }
 0x610   :  { %v1448_v30 = vsel %vm1447_vm15, %v1446_v12, %v1435_v24 }
 0x611   :  { %1449 = vst [vmem:[%s2557_s2] sm:$0xf] %v1448_v30 }

</bundles_post_ra>
